<compile_context>
chip_gen: v5e
topology: v5e:2x2
jax: 0.10.0
libtpu: 0.0.40
codegen_flags: <defaults>
</compile_context>

<pallas_src>
import math

import jax
import jax.numpy as jnp
from jax.experimental import pallas as pl
from jax.experimental.pallas import tpu as pltpu


def _round_up(x, m):
    return ((x + m - 1) // m) * m


def _lm_head_kernel(x_ref, w_ref, o_ref):
    # x_ref: (tm, D) hidden tile, w_ref: (tv, D) weight tile (nn.Linear layout),
    # o_ref: (tm, tv) logits tile.  logits = x @ W.T, expressed as a dot_general
    # contracting on D so the MXU is fed without an XLU transpose.
    o_ref[...] = jax.lax.dot_general(
        x_ref[...],
        w_ref[...],
        dimension_numbers=(((1,), (1,)), ((), ())),
        preferred_element_type=jnp.float32,
    ).astype(o_ref.dtype)


def lm_head_matmul(hidden, weight, *, tm=256, tv=512,
                   compute_dtype=jnp.bfloat16, out_dtype=jnp.float32):
    """hidden: (M, D), weight: (V, D) (nn.Linear layout) -> (M, V) logits."""
    M, D = hidden.shape
    V, D2 = weight.shape
    assert D == D2, "hidden/weight feature dims must match"

    # Cast once in the wrapper: bf16 weight stream halves HBM traffic and hits
    # the bf16 MXU rate; accumulation stays f32 via preferred_element_type.
    hidden = hidden.astype(compute_dtype)
    weight = weight.astype(compute_dtype)

    # Effective tile sizes: keep (8, 128) sublane/lane alignment and shrink for
    # tiny inputs so blocks never exceed the (padded) arrays.
    tm_eff = min(tm, _round_up(M, 8))
    tv_eff = min(tv, _round_up(V, 128))

    # Pad to whole tiles so the grid math is exact (handles vocab sizes that
    # are not multiples of the tile).
    M_pad = _round_up(M, tm_eff)
    V_pad = _round_up(V, tv_eff)
    if M_pad != M:
        hidden = jnp.pad(hidden, ((0, M_pad - M), (0, 0)))
    if V_pad != V:
        weight = jnp.pad(weight, ((0, V_pad - V), (0, 0)))

    grid = (M_pad // tm_eff, V_pad // tv_eff)   # M outer, vocab inner

    cost = pl.CostEstimate(
        flops=2 * M_pad * V_pad * D,
        transcendentals=0,
        bytes_accessed=(
            hidden.size * hidden.dtype.itemsize
            + weight.size * weight.dtype.itemsize * grid[0]
            + M_pad * V_pad * jnp.dtype(out_dtype).itemsize
        ),
    )

    out = pl.pallas_call(
        _lm_head_kernel,
        out_shape=jax.ShapeDtypeStruct((M_pad, V_pad), out_dtype),
        grid_spec=pltpu.PrefetchScalarGridSpec(
            num_scalar_prefetch=0,
            grid=grid,
            in_specs=[
                # Hidden tile: index depends only on i -> resident across the
                # inner vocab axis (DMA'd once per M tile).
                pl.BlockSpec((tm_eff, D), lambda i, j: (i, 0)),
                # Vocab tile of the weight: streamed across the inner axis.
                pl.BlockSpec((tv_eff, D), lambda i, j: (j, 0)),
            ],
            out_specs=pl.BlockSpec((tm_eff, tv_eff), lambda i, j: (i, j)),
        ),
        compiler_params=pltpu.CompilerParams(
            # Both axes independent -> shard across v7x's two TensorCores;
            # harmless on single-TC v5e/v6e.
            dimension_semantics=("parallel", "parallel"),
            # Default tiles need ~13 MiB even at D=4096; 48 MiB keeps larger
            # tile sweeps double-buffered while staying under v7x's 64 MiB
            # physical VMEM.
            vmem_limit_bytes=48 * 1024 * 1024,
        ),
        cost_estimate=cost,
    )(hidden, weight)

    if M_pad != M or V_pad != V:
        out = out[:M, :V]
    return out


class LMHead:
    """JAX/Pallas port of the PyTorch LMHead module.

    forward(x): out = gpt(x); logits = out @ W_pred.T  (no bias).
    The `gpt` backbone is an injected external module with no definition in
    the reference, so it is stood in by its word-embedding lookup (plain-JAX
    glue); the prediction matmul hot path runs in the Pallas kernel.
    """

    def __init__(self, d_model, vocab_size, key):
        k_emb, k_pred = jax.random.split(key)
        # gpt.word_embedding.weight : (vocab_size, d_model)
        self.word_embedding = (
            jax.random.normal(k_emb, (vocab_size, d_model), jnp.float32) * 0.02
        )
        # nn.Linear(d_model, vocab_size, bias=False).weight : (vocab_size, d_model)
        bound = 1.0 / math.sqrt(d_model)
        self.prediction_weight = jax.random.uniform(
            k_pred, (vocab_size, d_model), jnp.float32, minval=-bound, maxval=bound
        )
        # NOTE: the PyTorch reference assigns `self.prediction.weights` (typo),
        # which does NOT tie the weights, so prediction keeps its own init here.

    def gpt(self, token_ids):
        # TODO(synk): the full GPT backbone is an external injected module with
        # no definition in the reference; stand-in = word-embedding lookup.
        return jnp.take(self.word_embedding, token_ids, axis=0)  # (B, S, D)

    def __call__(self, token_ids):
        out = self.gpt(token_ids)                      # (B, S, D)
        B, S, D = out.shape
        hidden = out.reshape(B * S, D)
        logits = lm_head_matmul(hidden, self.prediction_weight)  # (B*S, V) f32
        return logits.reshape(B, S, -1)                # (B, S, V)


if __name__ == "__main__":
    d_model = 32
    vocab_size = 256
    B, S = 2, 8

    key = jax.random.PRNGKey(0)
    k_params, k_tok = jax.random.split(key)

    model = LMHead(d_model, vocab_size, k_params)
    token_ids = jax.random.randint(k_tok, (B, S), 0, vocab_size, dtype=jnp.int32)

    logits = jax.block_until_ready(model(token_ids))

    # Reference 1: same bf16-input / f32-accum path in plain JAX.
    emb = jnp.take(model.word_embedding, token_ids, axis=0)
    ref_bf16 = jax.lax.dot_general(
        emb.astype(jnp.bfloat16),
        model.prediction_weight.astype(jnp.bfloat16),
        dimension_numbers=(((2,), (1,)), ((), ())),
        preferred_element_type=jnp.float32,
    )
    # Reference 2: full f32 math (looser tolerance covers the bf16 cast).
    ref_f32 = emb @ model.prediction_weight.T

    assert logits.shape == (B, S, vocab_size)
    assert jnp.allclose(logits, ref_bf16, atol=1e-4, rtol=1e-3)
    assert jnp.allclose(logits, ref_f32, atol=5e-3, rtol=5e-2)

    print("KERNEL_OK")
</pallas_src>

<mosaic_0001>
module attributes {stable_mosaic.version = 11 : i64} {
  func.func @_lm_head_kernel(%arg0: i32, %arg1: i32, %arg2: memref<16x32xbf16, #tpu.memory_space<vmem>>, %arg3: memref<256x32xbf16, #tpu.memory_space<vmem>>, %arg4: memref<16x256xf32, #tpu.memory_space<vmem>>) attributes {dimension_semantics = [#tpu.dimension_semantics<parallel>, #tpu.dimension_semantics<parallel>], iteration_bounds = array<i64: 1, 1>, scalar_prefetch = 0 : i64, scratch_operands = 0 : i64, tpu.core_type = #tpu.core_type<tc>, window_params = [{transform_indices = @transform_0, window_bounds = array<i64: 16, 32>}, {transform_indices = @transform_1, window_bounds = array<i64: 256, 32>}, {transform_indices = @transform_2, window_bounds = array<i64: 16, 256>}]} {
    %c0 = arith.constant 0 : index
    %c0_0 = arith.constant 0 : index
    %0 = vector.load %arg2[%c0, %c0_0] : memref<16x32xbf16, #tpu.memory_space<vmem>>, vector<16x32xbf16>
    %c0_1 = arith.constant 0 : index
    %c0_2 = arith.constant 0 : index
    %1 = vector.load %arg3[%c0_1, %c0_2] : memref<256x32xbf16, #tpu.memory_space<vmem>>, vector<256x32xbf16>
    %cst = arith.constant dense<0.000000e+00> : vector<16x256xf32>
    %2 = tpu.matmul %0, %1, %cst {dimension_numbers = #tpu.dot_dimension_numbers<[1], [1], [0], [0], [0, 0, 1, 0], [], []>} : vector<16x32xbf16>, vector<256x32xbf16>, vector<16x256xf32> -> vector<16x256xf32>
    %c0_3 = arith.constant 0 : index
    %c0_4 = arith.constant 0 : index
    %3 = vector.load %arg4[%c0_3, %c0_4] : memref<16x256xf32, #tpu.memory_space<vmem>>, vector<16x256xf32>
    tpu.vector_store %arg4[%c0_3, %c0_4], %2 {strides = array<i32>} : memref<16x256xf32, #tpu.memory_space<vmem>>, vector<16x256xf32>,
    return
  }
  func.func @transform_0(%arg0: i32, %arg1: i32) -> (i32, i32) {
    %c0_i32 = arith.constant 0 : i32
    %c0_i32_0 = arith.constant 0 : i32
    return %arg0, %c0_i32 : i32, i32
  }
  func.func @transform_1(%arg0: i32, %arg1: i32) -> (i32, i32) {
    %c0_i32 = arith.constant 0 : i32
    %c0_i32_0 = arith.constant 0 : i32
    return %arg1, %c0_i32 : i32, i32
  }
  func.func @transform_2(%arg0: i32, %arg1: i32) -> (i32, i32) {
    %c0_i32 = arith.constant 0 : i32
    return %arg0, %arg1 : i32, i32
  }
}

</mosaic_0001>

<bundles_post_ra>
// kernel: tpu_custom_call.1
= control target key start
LH: loop header
LB: loop body
LE: loop exit
PB: predicated region body
PF: predicated region fallthrough
CT: control target
= control target key end

     0   :  { %vm131_vm0 = vcmask 261120   ;;  %s439_s0 = inlined_call_operand.vmem [shape: bf16[16,32], index: 0, kind: input, shape index: {}]   ;;  %s440_s1 = inlined_call_operand.vmem [shape: bf16[256,32], index: 1, kind: input, shape index: {}]   ;;  %s441_s2 = inlined_call_operand.hbm [shape: f32[16,256], index: 2, kind: output, shape index: {}]  }
   0x1   :  { %v311_v0 = vld [vmem:[%s440_s1 + $0x38] sm:$0xff]  ;;  %v310_v4 = vld [vmem:[%s440_s1 + $0x30] sm:$0xff] }
   0x2   :  { %v319_v1 = vld [vmem:[%s440_s1 + $0x78] sm:$0xff]  ;;  %v157_v2 = vsel %vm131_vm0, %v311_v0, 0  ;;  %v318_v5 = vld [vmem:[%s440_s1 + $0x70] sm:$0xff] }
   0x3   :  { %v181_v3 = vsel %vm131_vm0, %v319_v1, 0  ;;  %183 = vmatpush.bf16.xpose.msra.mxu0 %v157_v2 }
   0x4   :  { %197 = vmatpush.bf16.xpose.msra.mxu1 %v181_v3 }
   0x5   :  { %7 = vsyncpa [#allocation3], 0  ;;  %v154_v6 = vsel %vm131_vm0, %v310_v4, 0  ;;  %v178_v7 = vsel %vm131_vm0, %v318_v5, 0  ;;  %v309_v8 = vld [vmem:[%s440_s1 + $0x28] sm:$0xff]  ;;  %v308_v12 = vld [vmem:[%s440_s1 + $0x20] sm:$0xff] }
   0x6   :  { %v317_v9 = vld [vmem:[%s440_s1 + $0x68] sm:$0xff]  ;;  %v151_v10 = vsel %vm131_vm0, %v309_v8, 0  ;;  %v316_v13 = vld [vmem:[%s440_s1 + $0x60] sm:$0xff]  ;;  %v148_v14 = vsel %vm131_vm0, %v308_v12, 0  ;;  %v307_v16 = vld [vmem:[%s440_s1 + $0x18] sm:$0xff]  ;;  %s349_s15 = smov [#allocation2]  }
   0x7   :  { %v175_v11 = vsel %vm131_vm0, %v317_v9, 0  ;;  %v172_v15 = vsel %vm131_vm0, %v316_v13, 0  ;;  %v315_v17 = vld [vmem:[%s440_s1 + $0x58] sm:$0xff]  ;;  %v145_v18 = vsel %vm131_vm0, %v307_v16, 0  ;;  %v306_v20 = vld [vmem:[%s440_s1 + $0x10] sm:$0xff]  ;;  %v305_v24 = vld [vmem:[%s440_s1 + $0x8] sm:$0xff] }
   0x8   :  { %v169_v19 = vsel %vm131_vm0, %v315_v17, 0  ;;  %v314_v21 = vld [vmem:[%s440_s1 + $0x50] sm:$0xff]  ;;  %v142_v22 = vsel %vm131_vm0, %v306_v20, 0  ;;  %v313_v25 = vld [vmem:[%s440_s1 + $0x48] sm:$0xff]  ;;  %v139_v26 = vsel %vm131_vm0, %v305_v24, 0  ;;  %v304_v28 = vld [vmem:[%s440_s1] sm:$0xff] }
   0x9   :  { %v166_v23 = vsel %vm131_vm0, %v314_v21, 0  ;;  %v163_v27 = vsel %vm131_vm0, %v313_v25, 0  ;;  %v312_v29 = vld [vmem:[%s440_s1 + $0x40] sm:$0xff]  ;;  %v136_v30 = vsel %vm131_vm0, %v304_v28, 0  ;;  %s219_s1 = sshll.u32 %s349_s15, 4  ;;  %s221_s18 = sshll.u32 %s441_s2, 4  ;;  %s220_s1 = int_to_ptr.vmem [resolvable:$true] %s219_s1  ;;  %s222_s18 = int_to_ptr.hbm [resolvable:$true] %s221_s18 }
   0xa   :  { %v160_v31 = vsel %vm131_vm0, %v312_v29, 0  ;;  %v303_v32 = vld [vmem:[%s439_s0] sm:$0xff]  ;;  %s350_s0 = smov 256   ;;  %s351_s19 = smov 16  }
   0xb   :  { %184 = vmatpush.bf16.xpose.msra.mxu0 %v154_v6 }
   0xc   :  { %198 = vmatpush.bf16.xpose.msra.mxu1 %v178_v7 }
  0x13   :  { %185 = vmatpush.bf16.xpose.msra.mxu0 %v151_v10 }
  0x14   :  { %199 = vmatpush.bf16.xpose.msra.mxu1 %v175_v11 }
  0x1b   :  { %186 = vmatpush.bf16.xpose.msra.mxu0 %v148_v14 }
  0x1c   :  { %200 = vmatpush.bf16.xpose.msra.mxu1 %v172_v15 }
  0x23   :  { %187 = vmatpush.bf16.xpose.msra.mxu0 %v145_v18 }
  0x24   :  { %201 = vmatpush.bf16.xpose.msra.mxu1 %v169_v19 }
  0x2b   :  { %188 = vmatpush.bf16.xpose.msra.mxu0 %v142_v22 }
  0x2c   :  { %202 = vmatpush.bf16.xpose.msra.mxu1 %v166_v23 }
  0x33   :  { %189 = vmatpush.bf16.xpose.msra.mxu0 %v139_v26 }
  0x34   :  { %203 = vmatpush.bf16.xpose.msra.mxu1 %v163_v27 }
  0x3b   :  { %190 = vmatpush.bf16.xpose.msra.mxu0 %v136_v30 }
  0x3c   :  { %204 = vmatpush.bf16.xpose.msra.mxu1 %v160_v31 }
  0x42   :  { %301 = vmatmul.msk.bf16.vlgmr.msra.gmra.mxu0 %vm131_vm0, %v303_v32 }
  0x43   :  { %302 = vmatmul.msk.bf16.vlgmr.msra.gmra.mxu1 %vm131_vm0, %v303_v32 }
  0xbf   :  { %v192_v33 = vpop.f32.mrf.mxu0 }
  0xc0   :  { %v206_v34 = vpop.f32.mrf.mxu1  ;;  %211 = vst [vmem:[#allocation2] sm:$0xff] %v192_v33 }
  0xc1   :  { %212 = vst [vmem:[#allocation2 + $0x8] sm:$0xff] %v206_v34 }
  0xc7   :  { %v194_v35 = vpop.f32.mrf.mxu0 }
  0xc8   :  { %v208_v36 = vpop.f32.mrf.mxu1  ;;  %213 = vst [vmem:[#allocation2 + $0x10] sm:$0xff] %v194_v35 }
  0xc9   :  { %214 = vst [vmem:[#allocation2 + $0x18] sm:$0xff] %v208_v36 }
  0xca   :  { %227 = dma.vmem_to_hbm [thread:$0]  %s220_s1, 512, %s222_s18, [#allocation3], %s350_s0, %s350_s0, %s351_s19  }
  0xcb   :  { %347 = dma.done.wait [#allocation3], 512  }
  0xcc   :  { %348 = vsyncadd [#allocation3], 4294966784 }
  0xcd   :  { %232 = vsyncpa [#allocation3], 1 }

</bundles_post_ra>
